<compile_context>
chip_gen: v7x
topology: tpu7x:2x2x1
jax: 0.10.0
libtpu: 0.0.40
codegen_flags: <defaults>
</compile_context>

<pallas_src>
import math

import jax
import jax.numpy as jnp
from jax.experimental import pallas as pl
from jax.experimental.pallas import tpu as pltpu

_LANES = 128
_MAX_FB = 1024  # cap per-step frequency block (working set stays << VMEM)


def _round_up(x, m):
    return ((x + m - 1) // m) * m


# ----------------------------------------------------------------------------- #
# Pallas kernel: one lane-dense block of frequencies, complex multiply-accumulate
# on packed real/imag float32 planes (leading axis 0 = real, 1 = imag).
#   out_r = sum_i xr*wr - xi*wi + br
#   out_i = sum_i xr*wi + xi*wr + bi
# Frequency is on the lane axis, so every op is a plain VPU elementwise op.
# ----------------------------------------------------------------------------- #
def _banded_freq_kernel(x_ref, w_ref, b_ref, o_ref):
    xr = x_ref[0]            # (B, Cin, FB)
    xi = x_ref[1]
    wr = w_ref[0]            # (Cin, Cout, FB)
    wi = w_ref[1]

    cin = xr.shape[1]
    out_shape = o_ref.shape[1:]   # (B, Cout, FB)

    # Fold bias into the accumulators -> exactly one lane-dense store per plane.
    acc_r = jnp.broadcast_to(b_ref[0][None], out_shape)
    acc_i = jnp.broadcast_to(b_ref[1][None], out_shape)

    # Unrolled VPU multiply-adds over the (small) input-channel axis.
    # NOTE: for large Cin/Cout an MXU-tiled (per-frequency matmul) path would be
    # preferable; this layer is used with small channel counts.
    for i in range(cin):
        xr_i = xr[:, i:i + 1, :]       # (B, 1, FB)
        xi_i = xi[:, i:i + 1, :]
        wr_i = wr[i:i + 1]             # (1, Cout, FB)
        wi_i = wi[i:i + 1]
        acc_r = acc_r + xr_i * wr_i - xi_i * wi_i
        acc_i = acc_i + xr_i * wi_i + xi_i * wr_i

    o_ref[0] = acc_r
    o_ref[1] = acc_i


def _banded_complex_apply(x_planes, w_planes, b_planes, *, fb):
    """x_planes: (2, B, Cin, F_pad); w_planes: (2, Cin, Cout, F_pad);
    b_planes: (2, Cout, F_pad).  F_pad is a multiple of `fb`.
    Returns (2, B, Cout, F_pad) float32 (index 0 = real, 1 = imag)."""
    _, B, Cin, Fp = x_planes.shape
    Cout = w_planes.shape[2]
    assert Fp % fb == 0
    n_blocks = Fp // fb

    grid_spec = pltpu.PrefetchScalarGridSpec(
        num_scalar_prefetch=0,
        grid=(n_blocks,),
        in_specs=[
            pl.BlockSpec((2, B, Cin, fb), lambda f: (0, 0, 0, f)),      # x
            pl.BlockSpec((2, Cin, Cout, fb), lambda f: (0, 0, 0, f)),   # w
            pl.BlockSpec((2, Cout, fb), lambda f: (0, 0, f)),           # bias
        ],
        out_specs=pl.BlockSpec((2, B, Cout, fb), lambda f: (0, 0, 0, f)),
    )

    return pl.pallas_call(
        _banded_freq_kernel,
        out_shape=jax.ShapeDtypeStruct((2, B, Cout, Fp), jnp.float32),
        grid_spec=grid_spec,
        compiler_params=pltpu.CompilerParams(
            dimension_semantics=("parallel",)),
    )(x_planes, w_planes, b_planes)


# ----------------------------------------------------------------------------- #
# BandedFourierLayer forward (rfft / irfft glue in plain JAX)
# ----------------------------------------------------------------------------- #
class BandedFourierLayerPallas:
    def __init__(self, in_channels, out_channels, band, num_bands, length=201,
                 key=jax.random.PRNGKey(0)):
        self.length = length
        self.total_freqs = length // 2 + 1
        self.in_channels = in_channels
        self.out_channels = out_channels
        self.band = band
        self.num_bands = num_bands
        self.num_freqs = (self.total_freqs // num_bands
                          + (self.total_freqs % num_bands
                             if band == num_bands - 1 else 0))
        self.start = band * (self.total_freqs // num_bands)
        self.end = self.start + self.num_freqs

        # Deterministic init mirroring torch's kaiming_uniform_(a=sqrt(5)) /
        # uniform bias bounds (synthetic params, not a checkpoint load).
        fan_in = in_channels * out_channels          # torch fan_in for 3-D weight
        gain = math.sqrt(2.0 / (1.0 + 5.0))
        w_bound = math.sqrt(3.0) * gain / math.sqrt(fan_in)
        b_bound = 1.0 / math.sqrt(fan_in)

        k_wr, k_wi, k_br, k_bi = jax.random.split(key, 4)
        wshape = (self.num_freqs, in_channels, out_channels)
        bshape = (self.num_freqs, out_channels)
        self.weight = (
            jax.random.uniform(k_wr, wshape, jnp.float32, -w_bound, w_bound)
            + 1j * jax.random.uniform(k_wi, wshape, jnp.float32, -w_bound, w_bound)
        ).astype(jnp.complex64)
        self.bias = (
            jax.random.uniform(k_br, bshape, jnp.float32, -b_bound, b_bound)
            + 1j * jax.random.uniform(k_bi, bshape, jnp.float32, -b_bound, b_bound)
        ).astype(jnp.complex64)

        # Kernel-friendly layout, computed ONCE: frequency on the (padded) lane
        # axis, packed real/imag float32 planes on a leading axis of size 2.
        f128 = _round_up(max(self.num_freqs, 1), _LANES)
        self.fb = min(f128, _MAX_FB)           # single grid step for typical bands
        self.f_pad = _round_up(f128, self.fb)
        pad_f = self.f_pad - self.num_freqs

        w_t = jnp.transpose(self.weight, (1, 2, 0))              # (Cin, Cout, F)
        self.w_planes = jnp.pad(
            jnp.stack([jnp.real(w_t), jnp.imag(w_t)], axis=0).astype(jnp.float32),
            ((0, 0), (0, 0), (0, 0), (0, pad_f)))                # (2, Cin, Cout, Fp)
        b_t = jnp.transpose(self.bias, (1, 0))                   # (Cout, F)
        self.b_planes = jnp.pad(
            jnp.stack([jnp.real(b_t), jnp.imag(b_t)], axis=0).astype(jnp.float32),
            ((0, 0), (0, 0), (0, pad_f)))                        # (2, Cout, Fp)

    def __call__(self, x):
        # x: (b, t, in_channels) float32
        b, t, _ = x.shape
        if t != self.length:
            raise ValueError(
                f"input time length {t} != layer length {self.length}")

        # TODO(synk): FFT has no Pallas TPU primitive; rfft/irfft stay in XLA.
        x_fft = jnp.fft.rfft(x.astype(jnp.float32), axis=1)      # (b, total, Cin)
        xb = jnp.transpose(x_fft[:, self.start:self.end], (0, 2, 1))  # (b, Cin, F)

        pad_f = self.f_pad - self.num_freqs
        x_planes = jnp.pad(
            jnp.stack([jnp.real(xb), jnp.imag(xb)], axis=0).astype(jnp.float32),
            ((0, 0), (0, 0), (0, 0), (0, pad_f)))                # (2, b, Cin, Fp)

        out = _banded_complex_apply(
            x_planes, self.w_planes, self.b_planes, fb=self.fb)  # (2, b, Cout, Fp)

        out_band = (out[0, :, :, :self.num_freqs]
                    + 1j * out[1, :, :, :self.num_freqs]).astype(jnp.complex64)
        out_band = jnp.transpose(out_band, (0, 2, 1))            # (b, F, Cout)

        out_fft = jnp.zeros((b, t // 2 + 1, self.out_channels), jnp.complex64)
        out_fft = out_fft.at[:, self.start:self.end].set(out_band)
        return jnp.fft.irfft(out_fft, n=t, axis=1)               # (b, t, Cout) f32


# ----------------------------------------------------------------------------- #
def _reference(x, weight, bias, start, end, out_channels):
    b, t, _ = x.shape
    x_fft = jnp.fft.rfft(x, axis=1)
    band = jnp.einsum('bti,tio->bto', x_fft[:, start:end], weight) + bias
    out_fft = jnp.zeros((b, t // 2 + 1, out_channels), jnp.complex64)
    out_fft = out_fft.at[:, start:end].set(band)
    return jnp.fft.irfft(out_fft, n=t, axis=1)


if __name__ == "__main__":
    # Small shapes consistent with the module's forward: x is (b, t, in_channels).
    B, T, CIN, COUT = 2, 16, 4, 8
    NUM_BANDS, BAND = 2, 1       # band 1 of 2 -> non-zero start, exercises the slice

    layer = BandedFourierLayerPallas(CIN, COUT, BAND, NUM_BANDS, length=T,
                                     key=jax.random.PRNGKey(0))

    x = jax.random.normal(jax.random.PRNGKey(1), (B, T, CIN), dtype=jnp.float32)

    fwd = jax.jit(layer.__call__)     # fuse the rfft / slice / pad glue in XLA
    out = fwd(x)
    out = jax.block_until_ready(out)

    ref = _reference(x, layer.weight, layer.bias, layer.start, layer.end, COUT)
    assert out.shape == (B, T, COUT)
    assert jnp.allclose(out, ref, atol=1e-4, rtol=1e-4), "mismatch vs reference"

    print("KERNEL_OK")
</pallas_src>

<mosaic_0001>
module attributes {stable_mosaic.version = 11 : i64} {
  func.func @_banded_freq_kernel(%arg0: i32, %arg1: memref<2x2x4x128xf32, #tpu.memory_space<vmem>>, %arg2: memref<2x4x8x128xf32, #tpu.memory_space<vmem>>, %arg3: memref<2x8x128xf32, #tpu.memory_space<vmem>>, %arg4: memref<2x2x8x128xf32, #tpu.memory_space<vmem>>) attributes {dimension_semantics = [#tpu.dimension_semantics<parallel>], iteration_bounds = array<i64: 1>, scalar_prefetch = 0 : i64, scratch_operands = 0 : i64, tpu.core_type = #tpu.core_type<tc>, window_params = [{transform_indices = @transform_0, window_bounds = array<i64: 2, 2, 4, 128>}, {transform_indices = @transform_1, window_bounds = array<i64: 2, 4, 8, 128>}, {transform_indices = @transform_2, window_bounds = array<i64: 2, 8, 128>}, {transform_indices = @transform_3, window_bounds = array<i64: 2, 2, 8, 128>}]} {
    %c0 = arith.constant 0 : index
    %c0_0 = arith.constant 0 : index
    %c0_1 = arith.constant 0 : index
    %c0_2 = arith.constant 0 : index
    %0 = vector.load %arg1[%c0, %c0_0, %c0_1, %c0_2] : memref<2x2x4x128xf32, #tpu.memory_space<vmem>>, vector<1x2x4x128xf32>
    %1 = vector.shape_cast %0 : vector<1x2x4x128xf32> to vector<2x4x128xf32>
    %c1 = arith.constant 1 : index
    %c0_3 = arith.constant 0 : index
    %c0_4 = arith.constant 0 : index
    %c0_5 = arith.constant 0 : index
    %2 = vector.load %arg1[%c1, %c0_3, %c0_4, %c0_5] : memref<2x2x4x128xf32, #tpu.memory_space<vmem>>, vector<1x2x4x128xf32>
    %3 = vector.shape_cast %2 : vector<1x2x4x128xf32> to vector<2x4x128xf32>
    %c0_6 = arith.constant 0 : index
    %c0_7 = arith.constant 0 : index
    %c0_8 = arith.constant 0 : index
    %c0_9 = arith.constant 0 : index
    %4 = vector.load %arg2[%c0_6, %c0_7, %c0_8, %c0_9] : memref<2x4x8x128xf32, #tpu.memory_space<vmem>>, vector<1x4x8x128xf32>
    %5 = vector.shape_cast %4 : vector<1x4x8x128xf32> to vector<4x8x128xf32>
    %c1_10 = arith.constant 1 : index
    %c0_11 = arith.constant 0 : index
    %c0_12 = arith.constant 0 : index
    %c0_13 = arith.constant 0 : index
    %6 = vector.load %arg2[%c1_10, %c0_11, %c0_12, %c0_13] : memref<2x4x8x128xf32, #tpu.memory_space<vmem>>, vector<1x4x8x128xf32>
    %7 = vector.shape_cast %6 : vector<1x4x8x128xf32> to vector<4x8x128xf32>
    %c0_14 = arith.constant 0 : index
    %c0_15 = arith.constant 0 : index
    %c0_16 = arith.constant 0 : index
    %8 = vector.load %arg3[%c0_14, %c0_15, %c0_16] : memref<2x8x128xf32, #tpu.memory_space<vmem>>, vector<1x8x128xf32>
    %9 = vector.shape_cast %8 : vector<1x8x128xf32> to vector<8x128xf32>
    %10 = vector.shape_cast %9 : vector<8x128xf32> to vector<1x8x128xf32>
    %11 = vector.shape_cast %10 : vector<1x8x128xf32> to vector<1x8x128xf32>
    %12 = vector.broadcast %11 : vector<1x8x128xf32> to vector<2x8x128xf32>
    %c1_17 = arith.constant 1 : index
    %c0_18 = arith.constant 0 : index
    %c0_19 = arith.constant 0 : index
    %13 = vector.load %arg3[%c1_17, %c0_18, %c0_19] : memref<2x8x128xf32, #tpu.memory_space<vmem>>, vector<1x8x128xf32>
    %14 = vector.shape_cast %13 : vector<1x8x128xf32> to vector<8x128xf32>
    %15 = vector.shape_cast %14 : vector<8x128xf32> to vector<1x8x128xf32>
    %16 = vector.shape_cast %15 : vector<1x8x128xf32> to vector<1x8x128xf32>
    %17 = vector.broadcast %16 : vector<1x8x128xf32> to vector<2x8x128xf32>
    %18 = vector.extract_strided_slice %1 {offsets = [0, 0, 0], sizes = [2, 1, 128], strides = [1, 1, 1]} : vector<2x4x128xf32> to vector<2x1x128xf32>
    %19 = vector.extract_strided_slice %3 {offsets = [0, 0, 0], sizes = [2, 1, 128], strides = [1, 1, 1]} : vector<2x4x128xf32> to vector<2x1x128xf32>
    %20 = vector.extract_strided_slice %5 {offsets = [0, 0, 0], sizes = [1, 8, 128], strides = [1, 1, 1]} : vector<4x8x128xf32> to vector<1x8x128xf32>
    %21 = vector.extract_strided_slice %7 {offsets = [0, 0, 0], sizes = [1, 8, 128], strides = [1, 1, 1]} : vector<4x8x128xf32> to vector<1x8x128xf32>
    %22 = vector.broadcast %18 : vector<2x1x128xf32> to vector<2x8x128xf32>
    %23 = vector.broadcast %20 : vector<1x8x128xf32> to vector<2x8x128xf32>
    %24 = arith.mulf %22, %23 : vector<2x8x128xf32>
    %25 = arith.addf %12, %24 : vector<2x8x128xf32>
    %26 = vector.broadcast %19 : vector<2x1x128xf32> to vector<2x8x128xf32>
    %27 = vector.broadcast %21 : vector<1x8x128xf32> to vector<2x8x128xf32>
    %28 = arith.mulf %26, %27 : vector<2x8x128xf32>
    %29 = arith.subf %25, %28 : vector<2x8x128xf32>
    %30 = vector.broadcast %18 : vector<2x1x128xf32> to vector<2x8x128xf32>
    %31 = vector.broadcast %21 : vector<1x8x128xf32> to vector<2x8x128xf32>
    %32 = arith.mulf %30, %31 : vector<2x8x128xf32>
    %33 = arith.addf %17, %32 : vector<2x8x128xf32>
    %34 = vector.broadcast %19 : vector<2x1x128xf32> to vector<2x8x128xf32>
    %35 = vector.broadcast %20 : vector<1x8x128xf32> to vector<2x8x128xf32>
    %36 = arith.mulf %34, %35 : vector<2x8x128xf32>
    %37 = arith.addf %33, %36 : vector<2x8x128xf32>
    %38 = vector.extract_strided_slice %1 {offsets = [0, 1, 0], sizes = [2, 1, 128], strides = [1, 1, 1]} : vector<2x4x128xf32> to vector<2x1x128xf32>
    %39 = vector.extract_strided_slice %3 {offsets = [0, 1, 0], sizes = [2, 1, 128], strides = [1, 1, 1]} : vector<2x4x128xf32> to vector<2x1x128xf32>
    %40 = vector.extract_strided_slice %5 {offsets = [1, 0, 0], sizes = [1, 8, 128], strides = [1, 1, 1]} : vector<4x8x128xf32> to vector<1x8x128xf32>
    %41 = vector.extract_strided_slice %7 {offsets = [1, 0, 0], sizes = [1, 8, 128], strides = [1, 1, 1]} : vector<4x8x128xf32> to vector<1x8x128xf32>
    %42 = vector.broadcast %38 : vector<2x1x128xf32> to vector<2x8x128xf32>
    %43 = vector.broadcast %40 : vector<1x8x128xf32> to vector<2x8x128xf32>
    %44 = arith.mulf %42, %43 : vector<2x8x128xf32>
    %45 = arith.addf %29, %44 : vector<2x8x128xf32>
    %46 = vector.broadcast %39 : vector<2x1x128xf32> to vector<2x8x128xf32>
    %47 = vector.broadcast %41 : vector<1x8x128xf32> to vector<2x8x128xf32>
    %48 = arith.mulf %46, %47 : vector<2x8x128xf32>
    %49 = arith.subf %45, %48 : vector<2x8x128xf32>
    %50 = vector.broadcast %38 : vector<2x1x128xf32> to vector<2x8x128xf32>
    %51 = vector.broadcast %41 : vector<1x8x128xf32> to vector<2x8x128xf32>
    %52 = arith.mulf %50, %51 : vector<2x8x128xf32>
    %53 = arith.addf %37, %52 : vector<2x8x128xf32>
    %54 = vector.broadcast %39 : vector<2x1x128xf32> to vector<2x8x128xf32>
    %55 = vector.broadcast %40 : vector<1x8x128xf32> to vector<2x8x128xf32>
    %56 = arith.mulf %54, %55 : vector<2x8x128xf32>
    %57 = arith.addf %53, %56 : vector<2x8x128xf32>
    %58 = vector.extract_strided_slice %1 {offsets = [0, 2, 0], sizes = [2, 1, 128], strides = [1, 1, 1]} : vector<2x4x128xf32> to vector<2x1x128xf32>
    %59 = vector.extract_strided_slice %3 {offsets = [0, 2, 0], sizes = [2, 1, 128], strides = [1, 1, 1]} : vector<2x4x128xf32> to vector<2x1x128xf32>
    %60 = vector.extract_strided_slice %5 {offsets = [2, 0, 0], sizes = [1, 8, 128], strides = [1, 1, 1]} : vector<4x8x128xf32> to vector<1x8x128xf32>
    %61 = vector.extract_strided_slice %7 {offsets = [2, 0, 0], sizes = [1, 8, 128], strides = [1, 1, 1]} : vector<4x8x128xf32> to vector<1x8x128xf32>
    %62 = vector.broadcast %58 : vector<2x1x128xf32> to vector<2x8x128xf32>
    %63 = vector.broadcast %60 : vector<1x8x128xf32> to vector<2x8x128xf32>
    %64 = arith.mulf %62, %63 : vector<2x8x128xf32>
    %65 = arith.addf %49, %64 : vector<2x8x128xf32>
    %66 = vector.broadcast %59 : vector<2x1x128xf32> to vector<2x8x128xf32>
    %67 = vector.broadcast %61 : vector<1x8x128xf32> to vector<2x8x128xf32>
    %68 = arith.mulf %66, %67 : vector<2x8x128xf32>
    %69 = arith.subf %65, %68 : vector<2x8x128xf32>
    %70 = vector.broadcast %58 : vector<2x1x128xf32> to vector<2x8x128xf32>
    %71 = vector.broadcast %61 : vector<1x8x128xf32> to vector<2x8x128xf32>
    %72 = arith.mulf %70, %71 : vector<2x8x128xf32>
    %73 = arith.addf %57, %72 : vector<2x8x128xf32>
    %74 = vector.broadcast %59 : vector<2x1x128xf32> to vector<2x8x128xf32>
    %75 = vector.broadcast %60 : vector<1x8x128xf32> to vector<2x8x128xf32>
    %76 = arith.mulf %74, %75 : vector<2x8x128xf32>
    %77 = arith.addf %73, %76 : vector<2x8x128xf32>
    %78 = vector.extract_strided_slice %1 {offsets = [0, 3, 0], sizes = [2, 1, 128], strides = [1, 1, 1]} : vector<2x4x128xf32> to vector<2x1x128xf32>
    %79 = vector.extract_strided_slice %3 {offsets = [0, 3, 0], sizes = [2, 1, 128], strides = [1, 1, 1]} : vector<2x4x128xf32> to vector<2x1x128xf32>
    %80 = vector.extract_strided_slice %5 {offsets = [3, 0, 0], sizes = [1, 8, 128], strides = [1, 1, 1]} : vector<4x8x128xf32> to vector<1x8x128xf32>
    %81 = vector.extract_strided_slice %7 {offsets = [3, 0, 0], sizes = [1, 8, 128], strides = [1, 1, 1]} : vector<4x8x128xf32> to vector<1x8x128xf32>
    %82 = vector.broadcast %78 : vector<2x1x128xf32> to vector<2x8x128xf32>
    %83 = vector.broadcast %80 : vector<1x8x128xf32> to vector<2x8x128xf32>
    %84 = arith.mulf %82, %83 : vector<2x8x128xf32>
    %85 = arith.addf %69, %84 : vector<2x8x128xf32>
    %86 = vector.broadcast %79 : vector<2x1x128xf32> to vector<2x8x128xf32>
    %87 = vector.broadcast %81 : vector<1x8x128xf32> to vector<2x8x128xf32>
    %88 = arith.mulf %86, %87 : vector<2x8x128xf32>
    %89 = arith.subf %85, %88 : vector<2x8x128xf32>
    %90 = vector.broadcast %78 : vector<2x1x128xf32> to vector<2x8x128xf32>
    %91 = vector.broadcast %81 : vector<1x8x128xf32> to vector<2x8x128xf32>
    %92 = arith.mulf %90, %91 : vector<2x8x128xf32>
    %93 = arith.addf %77, %92 : vector<2x8x128xf32>
    %94 = vector.broadcast %79 : vector<2x1x128xf32> to vector<2x8x128xf32>
    %95 = vector.broadcast %80 : vector<1x8x128xf32> to vector<2x8x128xf32>
    %96 = arith.mulf %94, %95 : vector<2x8x128xf32>
    %97 = arith.addf %93, %96 : vector<2x8x128xf32>
    %c0_20 = arith.constant 0 : index
    %c0_21 = arith.constant 0 : index
    %c0_22 = arith.constant 0 : index
    %c0_23 = arith.constant 0 : index
    %98 = vector.load %arg4[%c0_20, %c0_21, %c0_22, %c0_23] : memref<2x2x8x128xf32, #tpu.memory_space<vmem>>, vector<1x2x8x128xf32>
    %99 = vector.shape_cast %98 : vector<1x2x8x128xf32> to vector<2x8x128xf32>
    %100 = vector.shape_cast %89 : vector<2x8x128xf32> to vector<1x2x8x128xf32>
    tpu.vector_store %arg4[%c0_20, %c0_21, %c0_22, %c0_23], %100 {strides = array<i32>} : memref<2x2x8x128xf32, #tpu.memory_space<vmem>>, vector<1x2x8x128xf32>,
    %c1_24 = arith.constant 1 : index
    %c0_25 = arith.constant 0 : index
    %c0_26 = arith.constant 0 : index
    %c0_27 = arith.constant 0 : index
    %101 = vector.load %arg4[%c1_24, %c0_25, %c0_26, %c0_27] : memref<2x2x8x128xf32, #tpu.memory_space<vmem>>, vector<1x2x8x128xf32>
    %102 = vector.shape_cast %101 : vector<1x2x8x128xf32> to vector<2x8x128xf32>
    %103 = vector.shape_cast %97 : vector<2x8x128xf32> to vector<1x2x8x128xf32>
    tpu.vector_store %arg4[%c1_24, %c0_25, %c0_26, %c0_27], %103 {strides = array<i32>} : memref<2x2x8x128xf32, #tpu.memory_space<vmem>>, vector<1x2x8x128xf32>,
    return
  }
  func.func @transform_0(%arg0: i32) -> (i32, i32, i32, i32) {
    %c0_i32 = arith.constant 0 : i32
    %c0_i32_0 = arith.constant 0 : i32
    %c0_i32_1 = arith.constant 0 : i32
    %c0_i32_2 = arith.constant 0 : i32
    return %c0_i32, %c0_i32_0, %c0_i32_1, %arg0 : i32, i32, i32, i32
  }
  func.func @transform_1(%arg0: i32) -> (i32, i32, i32, i32) {
    %c0_i32 = arith.constant 0 : i32
    %c0_i32_0 = arith.constant 0 : i32
    %c0_i32_1 = arith.constant 0 : i32
    %c0_i32_2 = arith.constant 0 : i32
    return %c0_i32, %c0_i32_0, %c0_i32_1, %arg0 : i32, i32, i32, i32
  }
  func.func @transform_2(%arg0: i32) -> (i32, i32, i32) {
    %c0_i32 = arith.constant 0 : i32
    %c0_i32_0 = arith.constant 0 : i32
    %c0_i32_1 = arith.constant 0 : i32
    return %c0_i32, %c0_i32_0, %arg0 : i32, i32, i32
  }
  func.func @transform_3(%arg0: i32) -> (i32, i32, i32, i32) {
    %c0_i32 = arith.constant 0 : i32
    %c0_i32_0 = arith.constant 0 : i32
    %c0_i32_1 = arith.constant 0 : i32
    %c0_i32_2 = arith.constant 0 : i32
    return %c0_i32, %c0_i32_0, %c0_i32_1, %arg0 : i32, i32, i32, i32
  }
}

</mosaic_0001>

<bundles_post_ra>
// kernel: reverse.0
= control target key start
LH: loop header
LB: loop body
LE: loop exit
PB: predicated region body
PF: predicated region fallthrough
CT: control target
= control target key end

     0   :  { %v2_v0 = vlaneseq  ;;  %s117_s0 = inlined_call_operand.vmem [shape: f32[2,8,7], index: 0, kind: input, shape index: {}]   ;;  %s118_s1 = inlined_call_operand.vmem [shape: f32[2,8,7], index: 1, kind: output, shape index: {}]  }
   0x1   :  { %v34_v2 = vld [vmem:[%s117_s0] sm:$0xff]  ;;  %v36_v3 = vld [vmem:[%s117_s0 + $0x8] sm:$0xff] }
   0x2   :  { %v3_v1 = vsub.s32 6, %v2_v0 }
   0x4   :  { %4 = vset.pattern.permute.xlu0 %v3_v1 }
   0x5   :  { %42 = vperm.xlu0 %4, %v34_v2  }
   0x9   :  { %48 = vperm.xlu0 %4, %v36_v3  }
  0x84   :  { %v43_v4 = vpop.permute.xlu0 %42 }
  0x85   :  { %81 = vst [vmem:[%s118_s1] sm:$0xff] %v43_v4 }
  0x88   :  { %v49_v5 = vpop.permute.xlu0 %48 }
  0x89   :  { %83 = vst [vmem:[%s118_s1 + $0x8] sm:$0xff] %v49_v5 }

// kernel: a_call__.1
= control target key start
LH: loop header
LB: loop body
LE: loop exit
PB: predicated region body
PF: predicated region fallthrough
CT: control target
= control target key end

     0   :  { %v31_v0 = vlaneseq  ;;  %s273_s0 = inlined_call_operand.vmem [shape: f32[2,2,4,128], index: 0, kind: input, shape index: {}]   ;;  %s274_s1 = inlined_call_operand.vmem [shape: f32[2,4,8,128], index: 1, kind: input, shape index: {}]   ;;  %s275_s2 = inlined_call_operand.vmem [shape: f32[2,8,128], index: 2, kind: input, shape index: {}]   ;;  %s276_s3 = inlined_call_operand.vmem [shape: f32[2,2,8,128], index: 3, kind: output, shape index: {}]  }
   0x1   :  { %v14_v2 = vld [vmem:[%s273_s0] sm:$0xf]  ;;  %v168_v3 = vld [vmem:[%s273_s0 + $0x8] sm:$0xf]  ;;  %v15_v15 = vld [vmem:[%s273_s0 + $0x4] sm:$0xf] }
   0x2   :  { %v32_v1 = vshrl.u32 %v31_v0, 7  ;;  %v19_v6 = vld [vmem:[%s274_s1] sm:$0xff]  ;;  %v209_v9 = vld [vmem:[%s274_s1 + $0x8] sm:$0xff]  ;;  %v229_v24 = vld [vmem:[%s274_s1 + $0x10] sm:$0xff] }
   0x3   :  { %v170_v10 = vld [vmem:[%s274_s1 + $0x20] sm:$0xff]  ;;  %v169_v16 = vld [vmem:[%s273_s0 + $0xc] sm:$0xf]  ;;  %v234_v25 = vld [vmem:[%s274_s1 + $0x18] sm:$0xff] }
   0x4   :  { %v33_v4 = vsub.s32 0, %v32_v1  ;;  %v65_v5 = vsub.s32 1, %v32_v1  ;;  %v97_v7 = vsub.s32 2, %v32_v1  ;;  %v129_v8 = vsub.s32 3, %v32_v1  ;;  %v28_v14 = vld [vmem:[%s275_s2] sm:$0xff]  ;;  %v171_v30 = vld [vmem:[%s274_s1 + $0x28] sm:$0xff] }
   0x5   :  { %v172_v33 = vld [vmem:[%s274_s1 + $0x30] sm:$0xff]  ;;  %v174_v42 = vld [vmem:[%s275_s2 + $0x8] sm:$0xff]  ;;  %v173_v43 = vld [vmem:[%s274_s1 + $0x38] sm:$0xff] }
   0x6   :  { %v34_v11 = vrot.slane %v14_v2, %v33_v4  ;;  %v46_v12 = vrot.slane %v168_v3, %v33_v4  ;;  %v66_v13 = vrot.slane %v14_v2, %v65_v5  ;;  %v78_v19 = vrot.slane %v168_v3, %v65_v5 }
   0x7   :  { %v98_v21 = vrot.slane %v14_v2, %v97_v7  ;;  %v110_v22 = vrot.slane %v168_v3, %v97_v7  ;;  %v224_v23 = vrot.slane %v14_v2, %v129_v8  ;;  %v38_v27 = vrot.slane %v15_v15, %v33_v4 }
   0x8   :  { %v39_v17 = vmul.f32 %v34_v11, %v19_v6  ;;  %v51_v18 = vmul.f32 %v170_v10, %v46_v12  ;;  %v71_v20 = vmul.f32 %v66_v13, %v209_v9  ;;  %v50_v28 = vrot.slane %v169_v16, %v33_v4 }
   0x9   :  { %v70_v29 = vrot.slane %v15_v15, %v65_v5  ;;  %v142_v31 = vrot.slane %v168_v3, %v129_v8  ;;  %v82_v32 = vrot.slane %v169_v16, %v65_v5  ;;  %v83_v35 = vmul.f32 %v171_v30, %v78_v19 }
   0xa   :  { %v41_v26 = vadd.f32 %v39_v17, %v28_v14  ;;  %v40_v36 = vmul.f32 %v38_v27, %v19_v6  ;;  %v52_v37 = vmul.f32 %v170_v10, %v50_v28  ;;  %v103_v38 = vmul.f32 %v98_v21, %v229_v24 }
   0xb   :  { %v115_v39 = vmul.f32 %v172_v33, %v110_v22  ;;  %v135_v40 = vmul.f32 %v224_v23, %v234_v25  ;;  %v102_v41 = vrot.slane %v15_v15, %v97_v7  ;;  %v72_v46 = vmul.f32 %v70_v29, %v209_v9 }
   0xc   :  { %v53_v34 = vsub.f32 %v41_v26, %v51_v18  ;;  %v42_v45 = vadd.f32 %v40_v36, %v28_v14  ;;  %v55_v47 = vmul.f32 %v170_v10, %v34_v11  ;;  %v147_v48 = vmul.f32 %v173_v43, %v142_v31 }
   0xd   :  { %v84_v49 = vmul.f32 %v171_v30, %v82_v32  ;;  %v114_v50 = vrot.slane %v169_v16, %v97_v7  ;;  %v59_v51 = vmul.f32 %v46_v12, %v19_v6  ;;  %v87_v55 = vmul.f32 %v171_v30, %v66_v13 }
   0xe   :  { %v73_v44 = vadd.f32 %v71_v20, %v53_v34  ;;  %v54_v53 = vsub.f32 %v42_v45, %v52_v37  ;;  %v57_v54 = vadd.f32 %v174_v42, %v55_v47  ;;  %v104_v56 = vmul.f32 %v102_v41, %v229_v24 }
   0xf   :  { %v134_v57 = vrot.slane %v15_v15, %v129_v8  ;;  %v91_v58 = vmul.f32 %v78_v19, %v209_v9  ;;  %v56_v59 = vmul.f32 %v170_v10, %v38_v27  ;;  %v60_v63 = vmul.f32 %v50_v28, %v19_v6 }
  0x10   :  { %v85_v52 = vsub.f32 %v73_v44, %v83_v35  ;;  %v74_v61 = vadd.f32 %v72_v46, %v54_v53  ;;  %v61_v62 = vadd.f32 %v59_v51, %v57_v54  ;;  %v116_v0 = vmul.f32 %v172_v33, %v114_v50 }
  0x11   :  { %v146_v1 = vrot.slane %v169_v16, %v129_v8  ;;  %v58_v2 = vadd.f32 %v174_v42, %v56_v59  ;;  %v88_v3 = vmul.f32 %v171_v30, %v70_v29  ;;  %v119_v11 = vmul.f32 %v172_v33, %v98_v21 }
  0x12   :  { %v105_v60 = vadd.f32 %v103_v38, %v85_v52  ;;  %v86_v5 = vsub.f32 %v74_v61, %v84_v49  ;;  %v89_v7 = vadd.f32 %v87_v55, %v61_v62  ;;  %v136_v12 = vmul.f32 %v134_v57, %v234_v25 }
  0x13   :  { %v62_v13 = vadd.f32 %v60_v63, %v58_v2  ;;  %v92_v14 = vmul.f32 %v82_v32, %v209_v9  ;;  %v123_v18 = vmul.f32 %v110_v22, %v229_v24  ;;  %v148_v19 = vmul.f32 %v173_v43, %v146_v1 }
  0x14   :  { %v117_v4 = vsub.f32 %v105_v60, %v115_v39  ;;  %v106_v17 = vadd.f32 %v104_v56, %v86_v5  ;;  %v93_v10 = vadd.f32 %v91_v58, %v89_v7  ;;  %v120_v20 = vmul.f32 %v172_v33, %v102_v41 }
  0x15   :  { %v90_v6 = vadd.f32 %v88_v3, %v62_v13  ;;  %v151_v27 = vmul.f32 %v173_v43, %v224_v23  ;;  %v124_v21 = vmul.f32 %v114_v50, %v229_v24  ;;  %v155_v30 = vmul.f32 %v142_v31, %v234_v25 }
  0x16   :  { %v137_v15 = vadd.f32 %v135_v40, %v117_v4  ;;  %v118_v16 = vsub.f32 %v106_v17, %v116_v0  ;;  %v121_v26 = vadd.f32 %v119_v11, %v93_v10  ;;  %v152_v32 = vmul.f32 %v173_v43, %v134_v57 }
  0x17   :  { %v94_v28 = vadd.f32 %v92_v14, %v90_v6  ;;  %v156_v36 = vmul.f32 %v146_v1, %v234_v25 }
  0x18   :  { %v149_v8 = vsub.f32 %v137_v15, %v147_v48  ;;  %v138_v9 = vadd.f32 %v136_v12, %v118_v16  ;;  %v125_v29 = vadd.f32 %v123_v18, %v121_v26 }
  0x19   :  { %v122_v22 = vadd.f32 %v120_v20, %v94_v28 }
  0x1a   :  { %159 = vst [vmem:[%s276_s3] sm:$0xff] %v149_v8  ;;  %v150_v34 = vsub.f32 %v138_v9, %v148_v19  ;;  %v153_v33 = vadd.f32 %v151_v27, %v125_v29 }
  0x1b   :  { %v126_v35 = vadd.f32 %v124_v21, %v122_v22 }
  0x1c   :  { %160 = vst [vmem:[%s276_s3 + $0x8] sm:$0xff] %v150_v34  ;;  %v157_v23 = vadd.f32 %v155_v30, %v153_v33 }
  0x1d   :  { %v154_v24 = vadd.f32 %v152_v32, %v126_v35 }
  0x1e   :  { %175 = vst [vmem:[%s276_s3 + $0x10] sm:$0xff] %v157_v23 }
  0x1f   :  { %v158_v37 = vadd.f32 %v156_v36, %v154_v24 }
  0x21   :  { %176 = vst [vmem:[%s276_s3 + $0x18] sm:$0xff] %v158_v37 }

</bundles_post_ra>
